<compile_context>
chip_gen: v5e
topology: v5e:2x2
jax: 0.10.0
libtpu: 0.0.40
codegen_flags: <defaults>
</compile_context>

<pallas_src>
import functools

import jax
import jax.numpy as jnp
from jax.experimental import pallas as pl
from jax.experimental.pallas import tpu as pltpu


def _conv_z(x_ref, wdw_ref, bdw_ref, wpw_ref, bpw_ref, xp_ref, *,
            kernel_size, stride, padding, l_out, use_mxu):
    """Depthwise + pointwise conv for one (Cin, tile_n, L) tile -> (Cout, P) f32."""
    cin, tn, l = x_ref.shape
    cout = wpw_ref.shape[0]
    p = tn * l_out
    lp = l + 2 * padding

    # Zero only the pad columns (tiny); the interior is fully overwritten below.
    if padding > 0:
        zpad = jnp.zeros((cin, tn, padding), jnp.float32)
        xp_ref[:, :, :padding] = zpad
        xp_ref[:, :, lp - padding:] = zpad
    xp_ref[:, :, padding:padding + l] = x_ref[...].astype(jnp.float32)

    wdw = wdw_ref[...].astype(jnp.float32)              # (Cin, K)
    bdw = bdw_ref[...].astype(jnp.float32)              # (Cin, 1)

    def tap(k):
        if stride == 1:
            return xp_ref[:, :, k:k + l_out]
        return xp_ref[:, :, pl.ds(k, l_out, stride=stride)]

    # Depthwise conv (groups == Cin), unrolled over taps; bias folded into tap 0.
    y = tap(0) * wdw[:, 0:1][:, :, None] + bdw[:, :, None]
    for k in range(1, kernel_size):
        y = y + tap(k) * wdw[:, k:k + 1][:, :, None]

    # Lane-dense activation layout: (Cin, tile_n * Lout)
    y2 = y.reshape(cin, p)

    bpw = bpw_ref[...].astype(jnp.float32)               # (Cout, 1)
    if use_mxu:
        # bf16 operands + f32 accumulation: ~3x less MXU work than emulated f32.
        z = jnp.dot(wpw_ref[...].astype(jnp.bfloat16),
                    y2.astype(jnp.bfloat16),
                    preferred_element_type=jnp.float32) + bpw
    else:
        # Tiny-channel regime: unrolled VPU MAC, pointwise bias folded into init.
        wpw = wpw_ref[...].astype(jnp.float32)            # (Cout, Cin)
        z = wpw[:, 0:1] * y2[0:1, :] + bpw
        for ci in range(1, cin):
            z = z + wpw[:, ci:ci + 1] * y2[ci:ci + 1, :]
    return z                                              # (Cout, P) float32


def _stats_kernel(x_ref, wdw_ref, bdw_ref, wpw_ref, bpw_ref, stats_ref, xp_ref, *,
                  kernel_size, stride, padding, l_out, use_mxu):
    # stats_ref: (1, Cout, 2) -> per-tile [sum(z), sum((z - tile_mean)^2)]
    z = _conv_z(x_ref, wdw_ref, bdw_ref, wpw_ref, bpw_ref, xp_ref,
                kernel_size=kernel_size, stride=stride, padding=padding,
                l_out=l_out, use_mxu=use_mxu)
    p = z.shape[1]
    s = jnp.sum(z, axis=1, keepdims=True)                 # (Cout, 1)
    d = z - s * (1.0 / p)                                 # mean-shifted
    stats_ref[0, :, 0:1] = s
    stats_ref[0, :, 1:2] = jnp.sum(d * d, axis=1, keepdims=True)


def _bn_relu_kernel(x_ref, wdw_ref, bdw_ref, wpw_ref, bpw_ref,
                    scale_ref, shift_ref, o_ref, xp_ref, *,
                    kernel_size, stride, padding, l_out, use_mxu, ncl_store):
    # Recompute the conv (memory-bound regime: cheaper than an HBM z round trip),
    # then fused BN affine + ReLU.
    z = _conv_z(x_ref, wdw_ref, bdw_ref, wpw_ref, bpw_ref, xp_ref,
                kernel_size=kernel_size, stride=stride, padding=padding,
                l_out=l_out, use_mxu=use_mxu)
    r = jnp.maximum(z * scale_ref[...] + shift_ref[...], 0.0)   # (Cout, P)
    if ncl_store:
        # Lout is already lane-aligned: write the PyTorch NCL layout directly.
        cout, p = r.shape
        tn = p // l_out
        o_ref[...] = jnp.transpose(r.reshape(cout, tn, l_out), (1, 0, 2)
                                   ).astype(o_ref.dtype)
    else:
        # Lane-dense slab; the wrapper does the single NCL relayout in XLA.
        o_ref[...] = r.astype(o_ref.dtype)


def depthwise_separable_conv1d(x, w_dw, b_dw, w_pw, b_pw, gamma, beta, *,
                               stride=1, padding=0, eps=1e-5, block_n=None):
    """x: (N, Cin, L). Returns (N, Cout, Lout), matching the PyTorch module."""
    n, cin, l = x.shape
    cout = w_pw.shape[0]
    k = w_dw.shape[1]
    l_out = (l + 2 * padding - k) // stride + 1
    assert l_out > 0
    lp = l + 2 * padding

    # ---- Generation-aware VMEM capacity (v5e/v6e: 128 MiB, v7x: 64 MiB/TC) ----
    try:
        vmem_cap = int(getattr(pltpu.get_tpu_info(), "vmem_capacity_bytes",
                               64 << 20))
    except Exception:
        vmem_cap = 64 << 20

    def tile_bytes(bn):
        p_ = bn * l_out
        return 4 * (2 * cin * bn * l      # double-buffered input tile
                    + cin * bn * lp       # padded scratch
                    + 2 * cout * p_       # double-buffered output tile
                    + (cin + 2 * cout) * p_)  # f32 temporaries (y2, z, r)

    # ---- block_n selection: legal block shapes, lane-aligned p, >=2 grid steps ----
    if block_n is None:
        budget = int(0.35 * vmem_cap)
        divisors = [d for d in range(1, n + 1) if n % d == 0]

        def legal(d):
            in_ok = (d % 8 == 0) or (d == n)             # (Cin, d, L) sublane dim
            out_ok = ((d * l_out) % 128 == 0) or (d == n)  # (Cout, d*Lout) lane dim
            return in_ok and out_ok

        legal_divs = [d for d in divisors if legal(d)] or [n]
        feasible = [d for d in legal_divs if tile_bytes(d) <= budget]
        if not feasible:
            feasible = [min(legal_divs, key=tile_bytes)]

        def score(d):
            p_ = d * l_out
            aligned = (p_ % 128 == 0)
            multi = (n // d) >= 2        # v7x: keep both TensorCores busy
            if p_ < 512:
                band = p_ - 512
            elif p_ > 2048:
                band = 2048 - p_
            else:
                band = 0
            return (aligned, multi, band, p_)

        block_n = max(feasible, key=score)
    if n % block_n != 0:
        raise ValueError(f"block_n={block_n} must divide N={n}")
    grid_n = n // block_n
    p = block_n * l_out

    # Small contractions: an unrolled VPU MAC beats a mostly-idle MXU tile.
    use_mxu = cin >= 64

    weight_bytes = 4 * (cin * k + cin + cout * cin + 3 * cout)
    vmem_limit = int(min(max(2 * tile_bytes(block_n) + weight_bytes, 4 << 20),
                         int(0.75 * vmem_cap)))
    cparams = pltpu.CompilerParams(
        dimension_semantics=("parallel",),   # batch tiles are independent
        vmem_limit_bytes=vmem_limit)

    # One HBM-side relayout to channel-major (Cin, N, L): removes the per-tile
    # full-L transpose from both kernel stages.
    x_t = jnp.transpose(x, (1, 0, 2))
    b_dw2 = b_dw.reshape(cin, 1).astype(jnp.float32)
    b_pw2 = b_pw.reshape(cout, 1).astype(jnp.float32)

    common_in_specs = [
        pl.BlockSpec((cin, block_n, l), lambda i: (0, i, 0)),
        pl.BlockSpec((cin, k), lambda i: (0, 0)),
        pl.BlockSpec((cin, 1), lambda i: (0, 0)),
        pl.BlockSpec((cout, cin), lambda i: (0, 0)),
        pl.BlockSpec((cout, 1), lambda i: (0, 0)),
    ]
    scratch = [pltpu.VMEM((cin, block_n, lp), jnp.float32)]

    # ---- Stage 1: per-tile, mean-shifted BatchNorm partial statistics ----
    kernel1 = functools.partial(
        _stats_kernel, kernel_size=k, stride=stride, padding=padding,
        l_out=l_out, use_mxu=use_mxu)
    stats = pl.pallas_call(
        kernel1,
        grid=(grid_n,),
        in_specs=common_in_specs,
        out_specs=pl.BlockSpec((1, cout, 2), lambda i: (i, 0, 0)),
        out_shape=jax.ShapeDtypeStruct((grid_n, cout, 2), jnp.float32),
        scratch_shapes=scratch,
        compiler_params=cparams,
    )(x_t, w_dw, b_dw2, w_pw, b_pw2)

    # ---- Chan-style combine of per-tile (sum, M2) -> global mean / biased var ----
    count = float(n * l_out)
    sums = stats[:, :, 0]                                  # (grid_n, Cout)
    m2s = stats[:, :, 1]                                   # (grid_n, Cout)
    mean = jnp.sum(sums, axis=0) / count
    tile_mean = sums / float(p)
    m2_total = jnp.sum(m2s, axis=0) + float(p) * jnp.sum(
        (tile_mean - mean[None, :]) ** 2, axis=0)
    var = m2_total / count                                 # training-mode (biased)
    scale = gamma.astype(jnp.float32) * jax.lax.rsqrt(var + eps)
    shift = beta.astype(jnp.float32) - mean * scale

    # ---- Stage 2: recompute conv + fused BN affine + ReLU ----
    ncl_store = (l_out % 128 == 0)
    kernel2 = functools.partial(
        _bn_relu_kernel, kernel_size=k, stride=stride, padding=padding,
        l_out=l_out, use_mxu=use_mxu, ncl_store=ncl_store)
    if ncl_store:
        out_spec = pl.BlockSpec((block_n, cout, l_out), lambda i: (i, 0, 0))
        out_shape = jax.ShapeDtypeStruct((n, cout, l_out), x.dtype)
    else:
        out_spec = pl.BlockSpec((cout, p), lambda i: (0, i))
        out_shape = jax.ShapeDtypeStruct((cout, n * l_out), x.dtype)

    out = pl.pallas_call(
        kernel2,
        grid=(grid_n,),
        in_specs=common_in_specs + [
            pl.BlockSpec((cout, 1), lambda i: (0, 0)),
            pl.BlockSpec((cout, 1), lambda i: (0, 0)),
        ],
        out_specs=out_spec,
        out_shape=out_shape,
        scratch_shapes=scratch,
        compiler_params=cparams,
    )(x_t, w_dw, b_dw2, w_pw, b_pw2,
      scale.reshape(cout, 1), shift.reshape(cout, 1))

    if not ncl_store:
        # Single XLA relayout from the lane-dense slab back to PyTorch NCL.
        out = jnp.transpose(out.reshape(cout, n, l_out), (1, 0, 2))
    return out


def _reference(x, w_dw, b_dw, w_pw, b_pw, gamma, beta, stride, padding, eps):
    # Pure-JAX reference of the PyTorch forward (training-mode BatchNorm).
    n, cin, l = x.shape
    k = w_dw.shape[1]
    l_out = (l + 2 * padding - k) // stride + 1
    xp = jnp.pad(x, ((0, 0), (0, 0), (padding, padding)))
    y = jnp.zeros((n, cin, l_out), jnp.float32)
    for kk in range(k):
        y = y + xp[:, :, kk:kk + (l_out - 1) * stride + 1:stride] \
            * w_dw[None, :, kk, None]
    y = y + b_dw[None, :, None]
    z = jnp.einsum('oc,ncl->nol', w_pw, y) + b_pw[None, :, None]
    mean = z.mean(axis=(0, 2), keepdims=True)
    var = ((z - mean) ** 2).mean(axis=(0, 2), keepdims=True)
    zn = (z - mean) / jnp.sqrt(var + eps) * gamma[None, :, None] + beta[None, :, None]
    return jnp.maximum(zn, 0.0)


if __name__ == "__main__":
    # Small, module-consistent shapes; N=16 with auto block_n=8 exercises a
    # 2-step grid (cross-tile BatchNorm combine) and a lane-aligned p=128 slab.
    N, CIN, COUT, L, K = 16, 4, 8, 16, 3
    STRIDE, PADDING = 1, 1

    key = jax.random.PRNGKey(0)
    kx, k1, k2, k3, k4, k5, k6 = jax.random.split(key, 7)

    x = jax.random.normal(kx, (N, CIN, L), dtype=jnp.float32)
    # Parameter shapes per nn.Conv1d / nn.BatchNorm1d (squeezed singleton dims).
    w_dw = jax.random.normal(k1, (CIN, K), dtype=jnp.float32) * 0.3     # (Cin,1,K)
    b_dw = jax.random.normal(k2, (CIN,), dtype=jnp.float32) * 0.1
    w_pw = jax.random.normal(k3, (COUT, CIN), dtype=jnp.float32) * 0.3  # (Cout,Cin,1)
    b_pw = jax.random.normal(k4, (COUT,), dtype=jnp.float32) * 0.1
    gamma = 1.0 + 0.1 * jax.random.normal(k5, (COUT,), dtype=jnp.float32)
    beta = 0.1 * jax.random.normal(k6, (COUT,), dtype=jnp.float32)

    out = depthwise_separable_conv1d(
        x, w_dw, b_dw, w_pw, b_pw, gamma, beta,
        stride=STRIDE, padding=PADDING)
    out = jax.block_until_ready(out)

    ref = _reference(x, w_dw, b_dw, w_pw, b_pw, gamma, beta,
                     STRIDE, PADDING, 1e-5)
    L_OUT = (L + 2 * PADDING - K) // STRIDE + 1
    assert out.shape == (N, COUT, L_OUT)
    assert jnp.allclose(out, ref, atol=1e-4, rtol=1e-4), "mismatch vs reference"

    print("KERNEL_OK")
</pallas_src>

<mosaic_0001>
module attributes {stable_mosaic.version = 11 : i64} {
  func.func @_stats_kernel(%arg0: i32, %arg1: memref<4x8x16xf32, #tpu.memory_space<vmem>>, %arg2: memref<4x3xf32, #tpu.memory_space<vmem>>, %arg3: memref<4x1xf32, #tpu.memory_space<vmem>>, %arg4: memref<8x4xf32, #tpu.memory_space<vmem>>, %arg5: memref<8x1xf32, #tpu.memory_space<vmem>>, %arg6: memref<1x8x2xf32, #tpu.memory_space<vmem>>, %arg7: memref<4x8x18xf32, #tpu.memory_space<vmem>>) attributes {dimension_semantics = [#tpu.dimension_semantics<parallel>], iteration_bounds = array<i64: 2>, scalar_prefetch = 0 : i64, scratch_operands = 1 : i64, tpu.core_type = #tpu.core_type<tc>, window_params = [{transform_indices = @transform_0, window_bounds = array<i64: 4, 8, 16>}, {pipeline_mode = #tpu.pipeline_mode<synchronous>, transform_indices = @transform_1, window_bounds = array<i64: 4, 3>}, {pipeline_mode = #tpu.pipeline_mode<synchronous>, transform_indices = @transform_2, window_bounds = array<i64: 4, 1>}, {pipeline_mode = #tpu.pipeline_mode<synchronous>, transform_indices = @transform_3, window_bounds = array<i64: 8, 4>}, {pipeline_mode = #tpu.pipeline_mode<synchronous>, transform_indices = @transform_4, window_bounds = array<i64: 8, 1>}, {transform_indices = @transform_5, window_bounds = array<i64: 1, 8, 2>}]} {
    %cst = arith.constant 0.000000e+00 : f32
    %0 = vector.broadcast %cst : f32 to vector<4x8x1xf32>
    %c0 = arith.constant 0 : index
    %c0_0 = arith.constant 0 : index
    %c0_1 = arith.constant 0 : index
    %1 = vector.load %arg7[%c0, %c0_0, %c0_1] : memref<4x8x18xf32, #tpu.memory_space<vmem>>, vector<4x8x1xf32>
    tpu.vector_store %arg7[%c0, %c0_0, %c0_1], %0 {strides = array<i32>} : memref<4x8x18xf32, #tpu.memory_space<vmem>>, vector<4x8x1xf32>,
    %c0_2 = arith.constant 0 : index
    %c0_3 = arith.constant 0 : index
    %c17 = arith.constant 17 : index
    %2 = vector.load %arg7[%c0_2, %c0_3, %c17] : memref<4x8x18xf32, #tpu.memory_space<vmem>>, vector<4x8x1xf32>
    tpu.vector_store %arg7[%c0_2, %c0_3, %c17], %0 {strides = array<i32>} : memref<4x8x18xf32, #tpu.memory_space<vmem>>, vector<4x8x1xf32>,
    %c0_4 = arith.constant 0 : index
    %c0_5 = arith.constant 0 : index
    %c0_6 = arith.constant 0 : index
    %3 = vector.load %arg1[%c0_4, %c0_5, %c0_6] : memref<4x8x16xf32, #tpu.memory_space<vmem>>, vector<4x8x16xf32>
    %c0_7 = arith.constant 0 : index
    %c0_8 = arith.constant 0 : index
    %c1 = arith.constant 1 : index
    %4 = vector.load %arg7[%c0_7, %c0_8, %c1] : memref<4x8x18xf32, #tpu.memory_space<vmem>>, vector<4x8x16xf32>
    tpu.vector_store %arg7[%c0_7, %c0_8, %c1], %3 {strides = array<i32>} : memref<4x8x18xf32, #tpu.memory_space<vmem>>, vector<4x8x16xf32>,
    %c0_9 = arith.constant 0 : index
    %c0_10 = arith.constant 0 : index
    %5 = vector.load %arg2[%c0_9, %c0_10] : memref<4x3xf32, #tpu.memory_space<vmem>>, vector<4x3xf32>
    %c0_11 = arith.constant 0 : index
    %c0_12 = arith.constant 0 : index
    %6 = vector.load %arg3[%c0_11, %c0_12] : memref<4x1xf32, #tpu.memory_space<vmem>>, vector<4x1xf32>
    %c0_13 = arith.constant 0 : index
    %c0_14 = arith.constant 0 : index
    %c0_15 = arith.constant 0 : index
    %7 = vector.load %arg7[%c0_13, %c0_14, %c0_15] : memref<4x8x18xf32, #tpu.memory_space<vmem>>, vector<4x8x16xf32>
    %8 = vector.extract_strided_slice %5 {offsets = [0, 0], sizes = [4, 1], strides = [1, 1]} : vector<4x3xf32> to vector<4x1xf32>
    %9 = vector.shape_cast %8 : vector<4x1xf32> to vector<4x1x1xf32>
    %10 = vector.broadcast %9 : vector<4x1x1xf32> to vector<4x8x16xf32>
    %11 = arith.mulf %7, %10 : vector<4x8x16xf32>
    %12 = vector.shape_cast %6 : vector<4x1xf32> to vector<4x1x1xf32>
    %13 = vector.broadcast %12 : vector<4x1x1xf32> to vector<4x8x16xf32>
    %14 = arith.addf %11, %13 : vector<4x8x16xf32>
    %c0_16 = arith.constant 0 : index
    %c0_17 = arith.constant 0 : index
    %c1_18 = arith.constant 1 : index
    %15 = vector.load %arg7[%c0_16, %c0_17, %c1_18] : memref<4x8x18xf32, #tpu.memory_space<vmem>>, vector<4x8x16xf32>
    %16 = vector.extract_strided_slice %5 {offsets = [0, 1], sizes = [4, 1], strides = [1, 1]} : vector<4x3xf32> to vector<4x1xf32>
    %17 = vector.shape_cast %16 : vector<4x1xf32> to vector<4x1x1xf32>
    %18 = vector.broadcast %17 : vector<4x1x1xf32> to vector<4x8x16xf32>
    %19 = arith.mulf %15, %18 : vector<4x8x16xf32>
    %20 = arith.addf %14, %19 : vector<4x8x16xf32>
    %c0_19 = arith.constant 0 : index
    %c0_20 = arith.constant 0 : index
    %c2 = arith.constant 2 : index
    %21 = vector.load %arg7[%c0_19, %c0_20, %c2] : memref<4x8x18xf32, #tpu.memory_space<vmem>>, vector<4x8x16xf32>
    %22 = vector.extract_strided_slice %5 {offsets = [0, 2], sizes = [4, 1], strides = [1, 1]} : vector<4x3xf32> to vector<4x1xf32>
    %23 = vector.shape_cast %22 : vector<4x1xf32> to vector<4x1x1xf32>
    %24 = vector.broadcast %23 : vector<4x1x1xf32> to vector<4x8x16xf32>
    %25 = arith.mulf %21, %24 : vector<4x8x16xf32>
    %26 = arith.addf %20, %25 : vector<4x8x16xf32>
    %27 = vector.shape_cast %26 : vector<4x8x16xf32> to vector<4x128xf32>
    %c0_21 = arith.constant 0 : index
    %c0_22 = arith.constant 0 : index
    %28 = vector.load %arg5[%c0_21, %c0_22] : memref<8x1xf32, #tpu.memory_space<vmem>>, vector<8x1xf32>
    %c0_23 = arith.constant 0 : index
    %c0_24 = arith.constant 0 : index
    %29 = vector.load %arg4[%c0_23, %c0_24] : memref<8x4xf32, #tpu.memory_space<vmem>>, vector<8x4xf32>
    %30 = vector.extract_strided_slice %29 {offsets = [0, 0], sizes = [8, 1], strides = [1, 1]} : vector<8x4xf32> to vector<8x1xf32>
    %31 = vector.extract_strided_slice %27 {offsets = [0, 0], sizes = [1, 128], strides = [1, 1]} : vector<4x128xf32> to vector<1x128xf32>
    %32 = vector.broadcast %30 : vector<8x1xf32> to vector<8x128xf32>
    %33 = vector.broadcast %31 : vector<1x128xf32> to vector<8x128xf32>
    %34 = arith.mulf %32, %33 : vector<8x128xf32>
    %35 = vector.broadcast %28 : vector<8x1xf32> to vector<8x128xf32>
    %36 = arith.addf %34, %35 : vector<8x128xf32>
    %37 = vector.extract_strided_slice %29 {offsets = [0, 1], sizes = [8, 1], strides = [1, 1]} : vector<8x4xf32> to vector<8x1xf32>
    %38 = vector.extract_strided_slice %27 {offsets = [1, 0], sizes = [1, 128], strides = [1, 1]} : vector<4x128xf32> to vector<1x128xf32>
    %39 = vector.broadcast %37 : vector<8x1xf32> to vector<8x128xf32>
    %40 = vector.broadcast %38 : vector<1x128xf32> to vector<8x128xf32>
    %41 = arith.mulf %39, %40 : vector<8x128xf32>
    %42 = arith.addf %36, %41 : vector<8x128xf32>
    %43 = vector.extract_strided_slice %29 {offsets = [0, 2], sizes = [8, 1], strides = [1, 1]} : vector<8x4xf32> to vector<8x1xf32>
    %44 = vector.extract_strided_slice %27 {offsets = [2, 0], sizes = [1, 128], strides = [1, 1]} : vector<4x128xf32> to vector<1x128xf32>
    %45 = vector.broadcast %43 : vector<8x1xf32> to vector<8x128xf32>
    %46 = vector.broadcast %44 : vector<1x128xf32> to vector<8x128xf32>
    %47 = arith.mulf %45, %46 : vector<8x128xf32>
    %48 = arith.addf %42, %47 : vector<8x128xf32>
    %49 = vector.extract_strided_slice %29 {offsets = [0, 3], sizes = [8, 1], strides = [1, 1]} : vector<8x4xf32> to vector<8x1xf32>
    %50 = vector.extract_strided_slice %27 {offsets = [3, 0], sizes = [1, 128], strides = [1, 1]} : vector<4x128xf32> to vector<1x128xf32>
    %51 = vector.broadcast %49 : vector<8x1xf32> to vector<8x128xf32>
    %52 = vector.broadcast %50 : vector<1x128xf32> to vector<8x128xf32>
    %53 = arith.mulf %51, %52 : vector<8x128xf32>
    %54 = arith.addf %48, %53 : vector<8x128xf32>
    %cst_25 = arith.constant dense<0.000000e+00> : vector<8xf32>
    %55 = vector.multi_reduction <add>, %54, %cst_25 [1] : vector<8x128xf32> to vector<8xf32>
    %56 = vector.shape_cast %55 : vector<8xf32> to vector<8x1xf32>
    %cst_26 = arith.constant 7.812500e-03 : f32
    %57 = vector.broadcast %cst_26 : f32 to vector<8x1xf32>
    %58 = arith.mulf %56, %57 : vector<8x1xf32>
    %59 = vector.broadcast %58 : vector<8x1xf32> to vector<8x128xf32>
    %60 = arith.subf %54, %59 : vector<8x128xf32>
    %c0_27 = arith.constant 0 : index
    %c0_28 = arith.constant 0 : index
    %c0_29 = arith.constant 0 : index
    %61 = vector.load %arg6[%c0_27, %c0_28, %c0_29] : memref<1x8x2xf32, #tpu.memory_space<vmem>>, vector<1x8x1xf32>
    %62 = vector.shape_cast %61 : vector<1x8x1xf32> to vector<8x1xf32>
    %63 = vector.shape_cast %56 : vector<8x1xf32> to vector<1x8x1xf32>
    tpu.vector_store %arg6[%c0_27, %c0_28, %c0_29], %63 {strides = array<i32>} : memref<1x8x2xf32, #tpu.memory_space<vmem>>, vector<1x8x1xf32>,
    %64 = arith.mulf %60, %60 : vector<8x128xf32>
    %cst_30 = arith.constant dense<0.000000e+00> : vector<8xf32>
    %65 = vector.multi_reduction <add>, %64, %cst_30 [1] : vector<8x128xf32> to vector<8xf32>
    %66 = vector.shape_cast %65 : vector<8xf32> to vector<8x1xf32>
    %c0_31 = arith.constant 0 : index
    %c0_32 = arith.constant 0 : index
    %c1_33 = arith.constant 1 : index
    %67 = vector.load %arg6[%c0_31, %c0_32, %c1_33] : memref<1x8x2xf32, #tpu.memory_space<vmem>>, vector<1x8x1xf32>
    %68 = vector.shape_cast %67 : vector<1x8x1xf32> to vector<8x1xf32>
    %69 = vector.shape_cast %66 : vector<8x1xf32> to vector<1x8x1xf32>
    tpu.vector_store %arg6[%c0_31, %c0_32, %c1_33], %69 {strides = array<i32>} : memref<1x8x2xf32, #tpu.memory_space<vmem>>, vector<1x8x1xf32>,
    return
  }
  func.func @transform_0(%arg0: i32) -> (i32, i32, i32) {
    %c0_i32 = arith.constant 0 : i32
    %c0_i32_0 = arith.constant 0 : i32
    %c0_i32_1 = arith.constant 0 : i32
    return %c0_i32, %arg0, %c0_i32_0 : i32, i32, i32
  }
  func.func @transform_1(%arg0: i32) -> (i32, i32) {
    %c0_i32 = arith.constant 0 : i32
    %c0_i32_0 = arith.constant 0 : i32
    %c0_i32_1 = arith.constant 0 : i32
    return %c0_i32, %c0_i32_0 : i32, i32
  }
  func.func @transform_2(%arg0: i32) -> (i32, i32) {
    %c0_i32 = arith.constant 0 : i32
    %c0_i32_0 = arith.constant 0 : i32
    %c0_i32_1 = arith.constant 0 : i32
    return %c0_i32, %c0_i32_0 : i32, i32
  }
  func.func @transform_3(%arg0: i32) -> (i32, i32) {
    %c0_i32 = arith.constant 0 : i32
    %c0_i32_0 = arith.constant 0 : i32
    %c0_i32_1 = arith.constant 0 : i32
    return %c0_i32, %c0_i32_0 : i32, i32
  }
  func.func @transform_4(%arg0: i32) -> (i32, i32) {
    %c0_i32 = arith.constant 0 : i32
    %c0_i32_0 = arith.constant 0 : i32
    %c0_i32_1 = arith.constant 0 : i32
    return %c0_i32, %c0_i32_0 : i32, i32
  }
  func.func @transform_5(%arg0: i32) -> (i32, i32, i32) {
    %c0_i32 = arith.constant 0 : i32
    %c0_i32_0 = arith.constant 0 : i32
    %c0_i32_1 = arith.constant 0 : i32
    return %arg0, %c0_i32, %c0_i32_0 : i32, i32, i32
  }
}

</mosaic_0001>

<bundles_post_ra>
// kernel: tpu_custom_call.1
= control target key start
LH: loop header
LB: loop body
LE: loop exit
PB: predicated region body
PF: predicated region fallthrough
CT: control target
= control target key end

     0   :  { %10 = vsyncpa [#allocation4], 0  ;;  %s950_s0 = inlined_call_operand.hbm [shape: f32[4,16,16], index: 0, kind: input, shape index: {}]   ;;  %s951_s1 = inlined_call_operand.vmem [shape: f32[4,3], index: 1, kind: input, shape index: {}]   ;;  %s952_s2 = inlined_call_operand.vmem [shape: f32[4,1], index: 2, kind: input, shape index: {}]   ;;  %s953_s3 = inlined_call_operand.vmem [shape: f32[8,4], index: 3, kind: input, shape index: {}]   ;;  %s954_s4 = inlined_call_operand.vmem [shape: f32[8,1], index: 4, kind: input, shape index: {}]   ;;  %s955_s5 = inlined_call_operand.vmem [shape: f32[2,8,2], index: 5, kind: output, shape index: {}]  }
   0x1   :  { %12 = vsyncpa [#allocation4 + $0x1], 0  ;;  %s827_s18 = smov 0   ;;  %s829_s19 = smov 0  }
   0x2   :  { %s831_s20 = smov 0   ;;  %s833_s21 = smov 0  }
   0x3 LB: > { %s846_s22 = sadd.s32 4294967295, %s775_s21   ;;  %s849_s23 = sadd.s32 1, %s775_s21   ;;  %s775_s21 = sphi %s833_s21, %s962_s21   ;;  %s771_s20 = sphi %s831_s20, %s961_s20   ;;  %s767_s19 = sphi %s829_s19, %s960_s19   ;;  %s763_s18 = sphi %s827_s18, %s959_s18  }
   0x4   : > { %s22_s24 = ssub.s32 %s775_s21, %s849_s23  ;;  %s25_s25 = sadd.s32 1, %s771_s20 }
   0x5   : > { %p23_p0 = scmp.eq.s32.totalorder %s22_s24, 0  ;;  %p32_p1 = scmp.ne.s32.totalorder %s771_s20, %s767_s19 }
   0x6   : > { %p33_p2 = scmp.eq.s32.totalorder %s775_s21, 0  ;;  %p38_p3 = scmp.ne.s32.totalorder %s767_s19, %s763_s18 }
   0x7   : > { %s859_s26 = scalar_select %p23_p0, %s771_s20, %s25_s25  }
   0x8   : > { %p861_p4 = por %p33_p2, %p32_p1  ;;  %p39_p5 = scmp.eq.s32.totalorder %s846_s22, 0 }
   0x9   : > { %p647_p6 = scmp.lt.s32.totalorder %s775_s21, 2  ;;  %s184_s29 = sand.u32 1, %s771_s20  }
   0xa   : > { %p867_p7 = por %p39_p5, %p38_p3  ;;  %s634_s30 = sshll.u32 %s184_s29, 5 }
   0xb   : > { %s635_s6 = sshll.u32 %s775_s21, 3  ;;  %s188_s10 = scalar_lea.vmem [#allocation3], %s634_s30 }
   0xc   : > { %s192_s9 = scalar_lea.hbm %s950_s0, %s635_s6  ;;  %s195_s11 = sshll.u32 %s188_s10, 4  ;;  %s196_s11 = int_to_ptr.vmem [resolvable:$true] %s195_s11 }
   0xd   : > { %s193_s12 = sshll.u32 %s192_s9, 4  ;;  %p878_p8 = pnand %p647_p6, %p861_p4  ;;  %s194_s12 = int_to_ptr.hbm [resolvable:$true] %s193_s12 }
   0xe   : > { %s185_s14 = scalar_lea.sflag [#allocation4], %s184_s29  ;;  %s711_s15 = sshra.s32 %s194_s12, 4  ;;  %s712_s15 = int_to_ptr.hbm [resolvable:$true] %s711_s15 }
   0xf   : > { %s713_s16 = scalar_lea.hbm %s712_s15, 32  ;;  %p715_p10 = pneg %p878_p8 }
  0x10   : > { %p714_p9 = scmp.ne.s32.totalorder %s712_s15, %s713_s16  ;;  %s718_s24 = scalar_lea.hbm %s950_s0, 64 }
  0x11   : > { %p719_p13 = scmp.lt.s32.totalorder %s712_s15, %s950_s0  ;;  %p720_p0 = scmp.lt.s32.totalorder %s718_s24, %s713_s16 }
  0x12   : > { %p716_p11 = pnand %p715_p10, %p714_p9 }
  0x13   : > { %p721_p1 = por %p720_p0, %p719_p13 }
  0x14   : > { %p717_p12 = pneg %p716_p11 }
  0x16   : > { %p722_p2 = pnand %p721_p1, %p717_p12 }
  0x18   : > { %725 = shalt.err (!%p722_p2)
}
  0x19   : > { %s777_s29 = smov 256   ;;  %s778_s30 = smov 128  }
  0x1a   : > { %s779_s6 = smov 8   ;;  %p636_p3 = scmp.ge.s32.totalorder %s775_s21, 1 }
  0x1b   : > { %646 = dma.hbm_to_vmem [thread:$0]  (!%p878_p8), %s194_s12, 512, %s196_s11, %s185_s14, %s777_s29, %s778_s30, %s779_s6  }
  0x1c   : > { %p203_p4 = scmp.lt.s32.totalorder %s775_s21, 3 }
  0x1e   : > { %p204_p5 = pnand %p636_p3, %p203_p4 }
  0x1f   : > { %s209_s7 = sand.u32 (!%p204_p5), 1, %s767_s19  }
  0x20   : > { %207 = sbr.rel (%p204_p5) target bundleno = 701 (0x2bd), region = 40  ;;  %s637_s8 = sshll.u32 (!%p204_p5), %s209_s7, 5 }
  0x21   : > { %s210_s9 = scalar_lea.sflag (!%p204_p5), [#allocation4], %s209_s7  ;;  %s213_s10 = scalar_lea.vmem (!%p204_p5), [#allocation3], %s637_s8 }
  0x25   : > { %758 = dma.done.wait (%p867_p7), %s210_s9, 512  }
  0x26   : > { %760 = vsyncadd (%p867_p7), %s210_s9, 4294966784  ;;  %v780_v0 = vmov 1   ;;  %v781_v1 = vmov 2   ;;  %v257_v2 = vld [vmem:[%s213_s10 + $0x18] sm:$0xff]  ;;  %v256_v3 = vld [vmem:[%s213_s10 + $0x10] sm:$0xff]  ;;  %s782_s12 = smov 1  }
  0x27   : > { %700 = vset.pattern.permute.xlu2 %v780_v0  ;;  %702 = vset.pattern.permute.xlu1 %v781_v1  ;;  %v279_v4 = vld [vmem:[%s951_s1] sm:$0xf]  ;;  %v255_v8 = vld [vmem:[%s213_s10 + $0x8] sm:$0xff]  ;;  %v783_v14 = vmov 0   ;;  %vm244_vm0 = vcmask 7168   ;;  %vm249_vm1 = vcmask 146568  }
  0x28   : > { %701 = vset.pattern.permute.xlu0 %v780_v0  ;;  %266 = vrot.lane.b32.xlu1 %v256_v3, %s782_s12  ;;  %v288_v5 = vrot.slane %v279_v4, 3  ;;  %v286_v7 = vrot.slane %v279_v4, 1  ;;  %v254_v9 = vld [vmem:[%s213_s10] sm:$0xff]  ;;  %v287_v11 = vrot.slane %v279_v4, 2  ;;  %v289_v13 = vperm.slane %v279_v4, 0  ;;  %s785_s14 = smov 127  }
  0x29   : > { %268 = vrot.lane.b32.xlu0 %v257_v2, %s782_s12  ;;  %v280_v15 = vld [vmem:[%s952_s2] sm:$0xf]  ;;  %v784_v23 = vmov 0.0   ;;  %vm274_vm2 = vcmask 138248   ;;  %s786_s15 = smov 126   ;;  %vm422_vm3 = vcmask 1047556  }
  0x2a   : > { %v292_v6 = vperm.slane %v288_v5, 0  ;;  %v290_v10 = vperm.slane %v286_v7, 0  ;;  %v291_v12 = vperm.slane %v287_v11, 0  ;;  %v316_v16 = vrot.slane %v280_v15, 3  ;;  %248 = vst.msk [vmem:[#allocation2 + $0x18] sm:$0xff] %vm244_vm0, %v784_v23  ;;  %s789_s16 = smov 64  }
  0x2b   : > { %v314_v17 = vrot.slane %v280_v15, 1  ;;  %v315_v20 = vrot.slane %v280_v15, 2  ;;  %v317_v22 = vperm.slane %v280_v15, 0  ;;  %253 = vst.msk [vmem:[#allocation2 + $0x18] sm:$0xff] %vm249_vm1, %v784_v23  ;;  %s790_s17 = smov 32   ;;  %s791_s18 = smov 96  }
  0x2c   : > { %354 = vperm.xlu2 %700, %v292_v6   ;;  %v320_v18 = vperm.slane %v316_v16, 0  ;;  %245 = vst.msk [vmem:[#allocation2] sm:$0xff] %vm244_vm0, %v784_v23  ;;  %s792_s24 = smov 80   ;;  %s793_s25 = smov 16   ;;  %vm506_vm4 = vcmask 130048   ;;  %vm508_vm5 = vcmask 261120  }
  0x2d   : > { %v318_v19 = vperm.slane %v314_v17, 0  ;;  %v319_v21 = vperm.slane %v315_v20, 0  ;;  %246 = vst.msk [vmem:[#allocation2 + $0x8] sm:$0xff] %vm244_vm0, %v784_v23  ;;  %s794_s27 = smov 48   ;;  %s795_s8 = smov 112   ;;  %vm510_vm6 = vcmask 392192  }
  0x2e   : > { %247 = vst.msk [vmem:[#allocation2 + $0x10] sm:$0xff] %vm244_vm0, %v784_v23  ;;  %vm512_vm7 = vcmask 523264   ;;  %vm514_vm8 = vcmask 654336   ;;  %vm516_vm9 = vcmask 785408   ;;  %vm518_vm10 = vcmask 916480   ;;  %p240_p6 = scmp.lt.s32.totalorder %s846_s22, 1 }
  0x2f   : > { %252 = vst.msk [vmem:[#allocation2 + $0x10] sm:$0xff] %vm249_vm1, %v784_v23  ;;  %vm564_vm11 = vcmask 15368  }
  0x30   : > { %262 = vrot.lane.b32.xlu1 %v254_v9, %s782_s12  ;;  %250 = vst.msk [vmem:[#allocation2] sm:$0xff] %vm249_vm1, %v784_v23  ;;  %s964_s22 = smov (!%p240_p6, %s846_s22), 1 }
  0x31   : > { %264 = vrot.lane.b32.xlu0 %v255_v8, %s782_s12  ;;  %251 = vst.msk [vmem:[#allocation2 + $0x8] sm:$0xff] %vm249_vm1, %v784_v23  ;;  %v787_v8 = vmov 1983009808   ;;  %s638_s9 = sshll.u32 %s964_s22, 3 }
  0x32   : > { %v427_v9 = vunpack.c.l.s4 %v787_v8  ;;  %s243_s11 = scalar_lea.vmem %s955_s5, %s638_s9 }
  0x34   : > { %346 = vperm.xlu2 %700, %v290_v10   ;;  %v428_v17 = vunpack.c.0.s8 %v427_v9 }
  0x38   : > { %394 = vperm.xlu1 %702, %v292_v6  }
  0x39   : > { %350 = vperm.xlu0 %701, %v291_v12  }
  0x3c   : > { %342 = vperm.xlu2 %700, %v289_v13  }
  0x40   : > { %386 = vperm.xlu1 %702, %v290_v10  }
  0x41   : > { %704 = vset.pattern.permute.xlu0 %v781_v1 }
  0x42   : > { %382 = vperm.xlu0 %704, %v289_v13  }
  0x44   : > { %703 = vset.pattern.permute.xlu2 %v781_v1 }
  0x45   : > { %390 = vperm.xlu2 %703, %v291_v12  }
  0x48   : > { %705 = vset.pattern.permute.xlu1 %v783_v14 }
  0x49   : > { %306 = vperm.xlu1 %705, %v292_v6  }
  0x4a   : > { %707 = vset.pattern.permute.xlu0 %v783_v14 }
  0x4b   : > { %294 = vperm.xlu0 %707, %v289_v13  }
  0x4d   : > { %706 = vset.pattern.permute.xlu2 %v783_v14 }
  0x4e   : > { %298 = vperm.xlu2 %706, %v290_v10  }
  0x51   : > { %302 = vperm.xlu1 %705, %v291_v12  }
  0x56   : > { %334 = vperm.xlu2 %706, %v320_v18  }
  0x59   : > { %326 = vperm.xlu1 %705, %v318_v19  }
  0x5e   : > { %330 = vperm.xlu2 %706, %v319_v21  }
  0x61   : > { %708 = vset.pattern.permute.xlu1 %v780_v0 }
  0x66   : > { %322 = vperm.xlu2 %706, %v317_v22  }
  0x86   : > { %v355_v24 = vpop.permute.xlu2 %354 }
  0x8e   : > { %v347_v27 = vpop.permute.xlu2 %346 }
  0x96   : > { %v343_v32 = vpop.permute.xlu2 %342 }
  0x9a   : > { %v267_v26 = vpop.permute.xlu1 %266 }
  0x9b   : > { %v269_v25 = vpop.permute.xlu0 %268  ;;  %277 = vst.msk [vmem:[#allocation2 + $0x10] sm:$0xff] %vm274_vm2, %v267_v26  ;;  %v788_v26 = vmov 1934713408  }
  0x9c   : > { %278 = vst.msk [vmem:[#allocation2 + $0x18] sm:$0xff] %vm274_vm2, %v269_v25 }
  0x9f   : > { %v391_v41 = vpop.permute.xlu2 %390 }
  0xa2   : > { %v263_v29 = vpop.permute.xlu1 %262  ;;  %v283_v33 = vld [vmem:[#allocation2 + $0x10] sm:$0xff] }
  0xa3   : > { %v265_v28 = vpop.permute.xlu0 %264  ;;  %v284_v30 = vld [vmem:[#allocation2 + $0x18] sm:$0xff]  ;;  %275 = vst.msk [vmem:[#allocation2] sm:$0xff] %vm274_vm2, %v263_v29  ;;  %v399_v43 = vmul.f32 %v391_v41, %v283_v33 }
  0xa4   : > { %276 = vst.msk [vmem:[#allocation2 + $0x8] sm:$0xff] %vm274_vm2, %v265_v28  ;;  %v360_v31 = vmul.f32 %v355_v24, %v284_v30 }
  0xa6   : > { %371 = vrot.lane.b32.xlu1 %v360_v31, %s785_s14 }
  0xa8   : > { %v299_v49 = vpop.permute.xlu2 %298 }
  0xaa   : > { %v395_v36 = vpop.permute.xlu1 %394  ;;  %v281_v40 = vld [vmem:[#allocation2] sm:$0xff] }
  0xab   : > { %v282_v34 = vld [vmem:[#allocation2 + $0x8] sm:$0xff]  ;;  %v351_v35 = vpop.permute.xlu0 %350  ;;  %v400_v38 = vmul.f32 %v395_v36, %v284_v30  ;;  %v357_v45 = vmul.f32 %v343_v32, %v281_v40 }
  0xac   : > { %v359_v37 = vmul.f32 %v351_v35, %v283_v33  ;;  %v358_v39 = vmul.f32 %v347_v27, %v282_v34  ;;  %v310_v62 = vmul.f32 %v299_v49, %v282_v34  ;;  %v451_v27 = vunpack.c.l.s4 %v788_v26 }
  0xad   : > { %411 = vrot.lane.b32.xlu2 %v400_v38, %s786_s15 }
  0xae   : > { %369 = vrot.lane.b32.xlu1 %v359_v37, %s785_s14  ;;  %367 = vrot.lane.b32.xlu0 %v358_v39, %s785_s14 }
  0xb0   : > { %v335_v51 = vpop.permute.xlu2 %334 }
  0xb2   : > { %v387_v42 = vpop.permute.xlu1 %386 }
  0xb3   : > { %v398_v44 = vmul.f32 %v387_v42, %v282_v34  ;;  %v452_v34 = vunpack.c.0.s8 %v451_v27 }
  0xb4   : > { %v383_v46 = vpop.permute.xlu0 %382 }
  0xb5   : > { %409 = vrot.lane.b32.xlu2 %v399_v43, %s786_s15  ;;  %v397_v47 = vmul.f32 %v383_v46, %v281_v40 }
  0xb6   : > { %407 = vrot.lane.b32.xlu1 %v398_v44, %s786_s15  ;;  %365 = vrot.lane.b32.xlu0 %v357_v45, %s785_s14 }
  0xb8   : > { %v331_v53 = vpop.permute.xlu2 %330 }
  0xbb   : > { %v307_v48 = vpop.permute.xlu1 %306 }
  0xbc   : > { %v312_v56 = vmul.f32 %v307_v48, %v284_v30 }
  0xbd   : > { %v295_v55 = vpop.permute.xlu0 %294 }
  0xbe   : > { %405 = vrot.lane.b32.xlu0 %v397_v47, %s786_s15  ;;  %v340_v58 = vadd.f32 %v335_v51, %v312_v56  ;;  %v309_v15 = vmul.f32 %v295_v55, %v281_v40  ;;  %v520_v56 = vld [vmem:[%s954_s4] sm:$0xff] }
  0xc0   : > { %v323_v57 = vpop.permute.xlu2 %322 }
  0xc1   : > { %v337_v19 = vadd.f32 %v323_v57, %v309_v15  ;;  %v796_v57 = vmov 3  }
  0xc3   : > { %v303_v50 = vpop.permute.xlu1 %302 }
  0xc4   : > { %v311_v0 = vmul.f32 %v303_v50, %v283_v33 }
  0xc6   : > { %v339_v5 = vadd.f32 %v331_v53, %v311_v0 }
  0xcb   : > { %v327_v52 = vpop.permute.xlu1 %326 }
  0xcc   : > { %v338_v2 = vadd.f32 %v327_v52, %v310_v62 }
 0x107   : > { %v412_v63 = vpop.permute.xlu2 %411 }
 0x10f   : > { %v410_v16 = vpop.permute.xlu2 %409 }
 0x118   : > { %v372_v54 = vpop.permute.xlu1 %371 }
 0x119   : > { %v380_v60 = vadd.f32 %v372_v54, %v340_v58  ;;  %v521_v54 = vld [vmem:[%s953_s3] sm:$0xff] }
 0x11b   : > { %v420_v3 = vadd.f32 %v412_v63, %v380_v60 }
 0x11d   : > { %v434_v7 = vrot.slane %v420_v3, 4 }
 0x120   : > { %v370_v59 = vpop.permute.xlu1 %369  ;;  %v368_v61 = vpop.permute.xlu0 %367 }
 0x121   : > { %v378_v4 = vadd.f32 %v368_v61, %v338_v2  ;;  %v379_v12 = vadd.f32 %v370_v59, %v339_v5 }
 0x123   : > { %v419_v20 = vadd.f32 %v410_v16, %v379_v12 }
 0x125   : > { %v421_v24 = vrot.slane %v419_v20, 4 }
 0x128   : > { %v408_v6 = vpop.permute.xlu1 %407  ;;  %v366_v11 = vpop.permute.xlu0 %365 }
 0x129   : > { %v418_v10 = vadd.f32 %v408_v6, %v378_v4  ;;  %v377_v21 = vadd.f32 %v366_v11, %v337_v19 }
 0x12b   : > { %v435_v13 = vsel %vm422_vm3, %v434_v7, %v418_v10  ;;  %v436_v14 = vrot.slane %v418_v10, 4 }
 0x12c   : > { %v441_v22 = vperm.slane %v435_v13, %v428_v17 }
 0x12d   : > { %v437_v18 = vsel %vm422_vm3, %v420_v3, %v436_v14 }
 0x12e   : > { %v445_v28 = vperm.slane %v437_v18, %v428_v17  ;;  %v446_v31 = vrot.slane %v441_v22, 4 }
 0x130   : > { %v406_v23 = vpop.permute.xlu0 %405  ;;  %v458_v37 = vrot.slane %v445_v28, 4 }
 0x131   : > { %v417_v25 = vadd.f32 %v406_v23, %v377_v21 }
 0x133   : > { %v423_v29 = vsel %vm422_vm3, %v421_v24, %v417_v25  ;;  %v424_v30 = vrot.slane %v417_v25, 4 }
 0x134   : > { %v429_v32 = vperm.slane %v423_v29, %v428_v17 }
 0x135   : > { %v425_v33 = vsel %vm422_vm3, %v419_v20, %v424_v30 }
 0x136   : > { %v433_v35 = vperm.slane %v425_v33, %v428_v17  ;;  %v448_v36 = vrot.slane %v429_v32, 4  ;;  %v447_v38 = vsel %vm422_vm3, %v446_v31, %v429_v32 }
 0x137   : > { %v453_v45 = vperm.slane %v447_v38, %v452_v34 }
 0x138   : > { %v459_v39 = vsel %vm422_vm3, %v458_v37, %v433_v35  ;;  %v449_v40 = vsel %vm422_vm3, %v441_v22, %v448_v36  ;;  %v460_v41 = vrot.slane %v433_v35, 4 }
 0x139   : > { %v465_v42 = vperm.slane %v459_v39, %v452_v34  ;;  %v457_v43 = vperm.slane %v449_v40, %v452_v34  ;;  %v470_v48 = vrot.slane %v453_v45, 4 }
 0x13a   : > { %v461_v44 = vsel %vm422_vm3, %v445_v28, %v460_v41 }
 0x13b   : > { %491 = vrot.lane.b32.xlu1 %v465_v42, %s789_s16  ;;  %483 = vrot.lane.b32.xlu2 %v457_v43, %s790_s17  ;;  %v469_v46 = vperm.slane %v461_v44, %v452_v34  ;;  %v474_v47 = vrot.slane %v465_v42, 4  ;;  %v472_v49 = vrot.slane %v457_v43, 4  ;;  %v471_v51 = vsel %vm422_vm3, 0.0, %v470_v48 }
 0x13d   : > { %499 = vrot.lane.b32.xlu0 %v469_v46, %s791_s18  ;;  %v475_v50 = vsel %vm422_vm3, 0.0, %v474_v47  ;;  %v473_v52 = vsel %vm422_vm3, 0.0, %v472_v49  ;;  %v476_v53 = vrot.slane %v469_v46, 4 }
 0x13f   : > { %v477_v55 = vsel %vm422_vm3, 0.0, %v476_v53 }
 0x143   : > { %495 = vrot.lane.b32.xlu2 %v475_v50, %s792_s24  ;;  %479 = vrot.lane.b32.xlu1 %v471_v51, %s793_s25 }
 0x145   : > { %487 = vrot.lane.b32.xlu0 %v473_v52, %s794_s27 }
 0x14b   : > { %524 = vperm.xlu2 %706, %v521_v54   ;;  %503 = vrot.lane.b32.xlu1 %v477_v55, %s795_s8 }
 0x14d   : > { %531 = vperm.xlu0 %707, %v520_v56  }
 0x153   : > { %536 = vperm.xlu1 %708, %v521_v54   ;;  %709 = vset.pattern.permute.xlu2 %v781_v1 }
 0x154   : > { %543 = vperm.xlu2 %709, %v521_v54  }
 0x155   : > { %710 = vset.pattern.permute.xlu0 %v796_v57 }
 0x156   : > { %550 = vperm.xlu0 %710, %v521_v54  }
 0x195   : > { %v484_v58 = vpop.permute.xlu2 %483 }
 0x19d   : > { %v496_v61 = vpop.permute.xlu2 %495 }
 0x1a5   : > { %v525_v5 = vpop.permute.xlu2 %524 }
 0x1ad   : > { %v492_v59 = vpop.permute.xlu1 %491 }
 0x1ae   : > { %v544_v14 = vpop.permute.xlu2 %543 }
 0x1af   : > { %v500_v60 = vpop.permute.xlu0 %499 }
 0x1b5   : > { %v480_v62 = vpop.permute.xlu1 %479 }
 0x1b6   : > { %v507_v63 = vsel %vm506_vm4, %v453_v45, %v480_v62 }
 0x1b7   : > { %v488_v0 = vpop.permute.xlu0 %487  ;;  %v509_v2 = vsel %vm508_vm5, %v507_v63, %v484_v58 }
 0x1b8   : > { %v511_v3 = vsel %vm510_vm6, %v509_v2, %v488_v0 }
 0x1b9   : > { %v513_v4 = vsel %vm512_vm7, %v511_v3, %v492_v59 }
 0x1ba   : > { %v515_v1 = vsel %vm514_vm8, %v513_v4, %v496_v61 }
 0x1bb   : > { %v517_v6 = vsel %vm516_vm9, %v515_v1, %v500_v60 }
 0x1bd   : > { %v504_v7 = vpop.permute.xlu1 %503 }
 0x1be   : > { %v519_v8 = vsel %vm518_vm10, %v517_v6, %v504_v7 }
 0x1bf   : > { %v532_v9 = vpop.permute.xlu0 %531  ;;  %v527_v10 = vperm.slane %v519_v8, 0  ;;  %v546_v12 = vperm.slane %v519_v8, 2  ;;  %v539_v13 = vperm.slane %v519_v8, 1  ;;  %v553_v18 = vperm.slane %v519_v8, 3 }
 0x1c1   : > { %v528_v11 = vmul.f32 %v527_v10, %v525_v5  ;;  %v547_v19 = vmul.f32 %v546_v12, %v544_v14 }
 0x1c3   : > { %v534_v16 = vadd.f32 %v532_v9, %v528_v11 }
 0x1c5   : > { %v537_v15 = vpop.permute.xlu1 %536 }
 0x1c6   : > { %v540_v17 = vmul.f32 %v539_v13, %v537_v15 }
 0x1c8   : > { %v541_v20 = vadd.f32 %v540_v17, %v534_v16  ;;  %v551_v21 = vpop.permute.xlu0 %550 }
 0x1c9   : > { %v554_v22 = vmul.f32 %v553_v18, %v551_v21 }
 0x1ca   : > { %v548_v23 = vadd.f32 %v547_v19, %v541_v20 }
 0x1cc   : > { %v555_v24 = vadd.f32 %v554_v22, %v548_v23 }
 0x1ce   : > { %556 = vadd.xlane.f32.xlu1 %v555_v24 }
 0x241   : > { %v557_v25 = vpop.xlane.xlu1 %556 }
 0x242   : > { %v558_v26 = vmul.f32 0.0078125, %v557_v25  ;;  %560 = vst.msk [vmem:[%s243_s11] sm:$0xff] %vm244_vm0, %v557_v25 }
 0x244   : > { %v559_v27 = vsub.f32 %v555_v24, %v558_v26 }
 0x246   : > { %v561_v28 = vmul.f32 %v559_v27, %v559_v27 }
 0x248   : > { %562 = vadd.xlane.f32.xlu2 %v561_v28 }
 0x2bb   : > { %v563_v29 = vpop.xlane.xlu2 %562 }
 0x2bc   : > { %565 = vst.msk [vmem:[%s243_s11] sm:$0xff] %vm564_vm11, %v563_v29 }
 0x2bd PF: > { %p15_p7 = scmp.ge.s32.totalorder %s849_s23, 4   ;;  %s959_s18 = smov %s767_s19 }
 0x2be   : > { %s960_s19 = smov %s771_s20  ;;  %s961_s20 = smov %s859_s26 }
 0x2bf   : > { %s962_s21 = smov %s849_s23  ;;  %17 = sbr.rel (!%p15_p7) target bundleno = 3 (0x3), region = 80 }
 0x2c4   :  { %585 = vsyncpa [#allocation4], 1 }
 0x2c5   :  { %587 = vsyncpa [#allocation4 + $0x1], 1 }

</bundles_post_ra>
